<compile_context>
chip_gen: v7x
topology: tpu7x:2x2x1
jax: 0.10.0
libtpu: 0.0.40
codegen_flags: <defaults>
</compile_context>

<pallas_src>
import math

import numpy as np
import jax
import jax.numpy as jnp
from jax import lax
from jax.experimental import pallas as pl
from jax.experimental.pallas import tpu as pltpu


def _round_up(x: int, m: int) -> int:
    return ((x + m - 1) // m) * m


# ----------------------------------------------------------------------------
# Parameter / buffer construction (glue, plain numpy/JAX)
# ----------------------------------------------------------------------------
def build_positional_encoding_2d(d_model: int, height: int, width: int) -> jnp.ndarray:
    """Reproduces PositionalEncoding2D.__init__ buffer `pe` of shape (d_model, H, W)."""
    assert d_model % 4 == 0
    pe = np.zeros((d_model, height, width), dtype=np.float32)
    dm = d_model // 2
    div_term = np.exp(np.arange(0.0, dm, 2, dtype=np.float64) * -(math.log(10000.0) / dm))
    pos_w = np.arange(0.0, width, dtype=np.float64)[:, None]   # (W, 1)
    pos_h = np.arange(0.0, height, dtype=np.float64)[:, None]  # (H, 1)
    sin_w = np.sin(pos_w * div_term).T  # (dm/2, W)
    cos_w = np.cos(pos_w * div_term).T
    sin_h = np.sin(pos_h * div_term).T  # (dm/2, H)
    cos_h = np.cos(pos_h * div_term).T
    pe[0:dm:2, :, :] = np.repeat(sin_w[:, None, :], height, axis=1)
    pe[1:dm:2, :, :] = np.repeat(cos_w[:, None, :], height, axis=1)
    pe[dm::2, :, :] = np.repeat(sin_h[:, :, None], width, axis=2)
    pe[dm + 1::2, :, :] = np.repeat(cos_h[:, :, None], width, axis=2)
    return jnp.asarray(pe, dtype=jnp.float32)


def init_params(key, d_model: int, map_size: int, n_scalars: int):
    k_emb, k_w, k_b = jax.random.split(key, 3)
    # nn.Embedding(3, d_model), re-initialized uniform(-0.1, 0.1) as in __init__
    emb_w = jax.random.uniform(k_emb, (3, d_model), jnp.float32, -0.1, 0.1)
    # nn.Linear(n_scalars, d_model): PyTorch default init uniform(-1/sqrt(fan_in), ..)
    bound = 1.0 / math.sqrt(n_scalars)
    fc_w = jax.random.uniform(k_w, (n_scalars, d_model), jnp.float32, -bound, bound)  # (in, out)
    fc_b = jax.random.uniform(k_b, (1, d_model), jnp.float32, -bound, bound)
    pe = build_positional_encoding_2d(d_model, map_size, map_size)  # (D, H, W)
    return emb_w, fc_w, fc_b, pe


def build_fused_weight(emb_w, pe, fc_w, fc_b):
    """Transposed fused weight W^T of shape (D, K_pad), f32.

    K layout: [ fc_w (S) | emb_w + fc_b (3) | pe_w_tbl (W) | pe_h_tbl (H) | 0-pad ].

    PE2D is separable: channels [0, D/2) of `pe` depend only on w, channels
    [D/2, D) only on h, so pe[:, h, w] == pe_w_tbl[w] + pe_h_tbl[h] exactly (the
    tables are sliced from `pe` itself, so the split is bit-exact).  The Linear
    bias is folded into the 3 embedding rows (exactly one fires per entity).
    Everything stays f32 so the one-hot-matmul gather is exact.
    """
    S, D = fc_w.shape
    dm = D // 2
    H, W = pe.shape[1], pe.shape[2]
    pe_w_tbl = jnp.transpose(pe[:, 0, :]).at[:, dm:].set(0.0)   # (W, D): w-dependent half only
    pe_h_tbl = jnp.transpose(pe[:, :, 0]).at[:, :dm].set(0.0)   # (H, D): h-dependent half only
    k_raw = S + 3 + W + H
    k_pad = _round_up(k_raw, 128)
    w_fused = jnp.concatenate(
        [
            fc_w.astype(jnp.float32),
            (emb_w + fc_b).astype(jnp.float32),   # fold Linear bias into the 3 embedding rows
            pe_w_tbl.astype(jnp.float32),
            pe_h_tbl.astype(jnp.float32),
            jnp.zeros((k_pad - k_raw, D), jnp.float32),
        ],
        axis=0,
    )
    return w_fused.T  # (D, K_pad); lane dim K_pad is a multiple of 128


# ----------------------------------------------------------------------------
# Pallas kernel
# ----------------------------------------------------------------------------
def entity_embed_kernel(idx_ref, scal_ref, w_ref, out_ref, x_ref):
    # idx_ref : (1, tm)     int32 — packed per-entity one-hot row indices:
    #                               bits [0,8)   = typ            (rows [0,3))
    #                               bits [8,20)  = 3 + w           (rows [3,3+W))
    #                               bits [20,32) = 3 + W + h       (rows [3+W,3+W+H))
    # scal_ref: (S, tm)     f32   — scalar features, entities on the lane axis
    # w_ref   : (D, K_pad)  f32   — fused transposed weight (see build_fused_weight)
    # out_ref : (D, tm)     f32   — lane-dense output tile (tm multiple of 128)
    # x_ref   : (K_pad, tm) f32   — VMEM scratch holding X^T = [scalar^T ; one-hot]
    S = scal_ref.shape[0]
    k_pad, tm = x_ref.shape
    k_mask = k_pad - S   # one-hot region: 3 type rows + W + H position rows + zero pad

    packed = idx_ref[...]                 # (1, tm)
    r_typ = packed & 0xFF
    r_w = (packed >> 8) & 0xFFF
    r_h = (packed >> 20) & 0xFFF

    # Write the dot operand straight into scratch — no jnp.concatenate copy.
    x_ref[0:S, :] = scal_ref[...]
    rows = lax.broadcasted_iota(jnp.int32, (k_mask, tm), 0)
    # typ / w / h hit disjoint row ranges, so one OR'd mask covers all three;
    # padded rows beyond 3+W+H never match and their weight rows are zero anyway.
    x_ref[S:, :] = ((rows == r_typ) | (rows == r_w) | (rows == r_h)).astype(jnp.float32)

    # Single fused MXU pass: emb(typ) + PE_w[w] + PE_h[h] + scalar @ W + b.
    out_ref[...] = jnp.dot(w_ref[...], x_ref[...], preferred_element_type=jnp.float32)


def entity_embedding(typ, pos, scalar, emb_w, pe, fc_w, fc_b, map_size, *, tm=4096):
    """typ: (B, N) int32; pos: (B, N, 2) int32; scalar: (B, N, S) f32 -> (B, N, D) f32."""
    B, N = typ.shape
    S = scalar.shape[-1]
    D = emb_w.shape[1]
    M = B * N
    assert 3 + 2 * map_size <= 0xFFF, "map_size too large for the 12-bit index packing"

    w_t = build_fused_weight(emb_w, pe, fc_w, fc_b)   # (D, K_pad); K_pad = 128 here
    k_pad = w_t.shape[1]

    # Pack typ / w / h into ONE int32 per entity -> single-row index DMA per step.
    typ_flat = typ.reshape(M).astype(jnp.int32)                 # rows [0, 3)
    h_idx = pos[..., 0].reshape(M).astype(jnp.int32)
    w_idx = pos[..., 1].reshape(M).astype(jnp.int32)
    packed = typ_flat | ((3 + w_idx) << 8) | ((3 + map_size + h_idx) << 20)
    idx = packed.reshape(1, M)
    # Layout plumbing: entities on the lane axis.  (Secondary follow-up: keep the
    # (D, M) layout through to the consumer and drop these wrapper transposes.)
    scal_t = scalar.reshape(M, S).T.astype(jnp.float32)         # (S, M)

    # Tile along M: big tiles amortize the ~0.35us per-grid-step overhead, but
    # force >= 2 grid steps once M >= 256 so both v7x TensorCores get work
    # (v5e/v6e are single-TC, where this clamp is harmless).
    if M <= 128:
        tm = 128
    else:
        tm = max(128, min(_round_up(tm, 128), _round_up((M + 1) // 2, 128)))
    m_pad = _round_up(M, tm)
    pad = m_pad - M
    if pad:
        idx = jnp.pad(idx, ((0, 0), (0, pad)))
        scal_t = jnp.pad(scal_t, ((0, 0), (0, pad)))

    out_t = pl.pallas_call(
        entity_embed_kernel,
        out_shape=jax.ShapeDtypeStruct((D, m_pad), jnp.float32),
        grid_spec=pltpu.PrefetchScalarGridSpec(
            num_scalar_prefetch=0,
            grid=(m_pad // tm,),
            in_specs=[
                pl.BlockSpec((1, tm), lambda i: (0, i)),        # packed typ/w/h indices
                pl.BlockSpec((S, tm), lambda i: (0, i)),        # scalar features (transposed)
                pl.BlockSpec((D, k_pad), lambda i: (0, 0)),     # fused weight (grid-invariant, 16 KiB)
            ],
            out_specs=pl.BlockSpec((D, tm), lambda i: (0, i)),  # lane-dense output tile
            scratch_shapes=[pltpu.VMEM((k_pad, tm), jnp.float32)],  # X^T dot operand
        ),
        compiler_params=pltpu.CompilerParams(dimension_semantics=("parallel",)),
    )(idx, scal_t, w_t)

    # Wrapper-side layout plumbing back to the PyTorch (B, N, D) convention.
    return out_t[:, :M].T.reshape(B, N, D)


# ----------------------------------------------------------------------------
# Reference (plain JAX) for correctness check
# ----------------------------------------------------------------------------
def entity_embedding_ref(typ, pos, scalar, emb_w, pe, fc_w, fc_b):
    emb = emb_w[typ]                                                        # (B, N, D)
    pe_gather = jnp.transpose(pe[:, pos[..., 0], pos[..., 1]], (1, 2, 0))   # (B, N, D)
    fc = scalar @ fc_w + fc_b[0]                                            # (B, N, D)
    return emb + pe_gather + fc


if __name__ == "__main__":
    d_model = 32
    map_size = 16
    n_scalars = 8
    B, N = 2, 8

    key = jax.random.PRNGKey(0)
    k_typ, k_pos, k_scal, k_param = jax.random.split(key, 4)

    emb_w, fc_w, fc_b, pe = init_params(k_param, d_model, map_size, n_scalars)

    typ = jax.random.randint(k_typ, (B, N), 0, 3, dtype=jnp.int32)
    pos = jax.random.randint(k_pos, (B, N, 2), 0, map_size, dtype=jnp.int32)
    scalar = jax.random.normal(k_scal, (B, N, n_scalars), dtype=jnp.float32)

    out = entity_embedding(typ, pos, scalar, emb_w, pe, fc_w, fc_b, map_size)
    out = jax.block_until_ready(out)

    ref = entity_embedding_ref(typ, pos, scalar, emb_w, pe, fc_w, fc_b)
    assert out.shape == (B, N, d_model)
    np.testing.assert_allclose(np.asarray(out), np.asarray(ref), rtol=1e-5, atol=1e-5)

    print("KERNEL_OK")
</pallas_src>

<mosaic_0001>
module attributes {stable_mosaic.version = 11 : i64} {
  func.func @entity_embed_kernel(%arg0: i32, %arg1: memref<1x128xi32, #tpu.memory_space<vmem>>, %arg2: memref<8x128xf32, #tpu.memory_space<vmem>>, %arg3: memref<32x128xf32, #tpu.memory_space<vmem>>, %arg4: memref<32x128xf32, #tpu.memory_space<vmem>>, %arg5: memref<128x128xf32, #tpu.memory_space<vmem>>) attributes {dimension_semantics = [#tpu.dimension_semantics<parallel>], iteration_bounds = array<i64: 1>, scalar_prefetch = 0 : i64, scratch_operands = 1 : i64, tpu.core_type = #tpu.core_type<tc>, window_params = [{transform_indices = @transform_0, window_bounds = array<i64: 1, 128>}, {transform_indices = @transform_1, window_bounds = array<i64: 8, 128>}, {pipeline_mode = #tpu.pipeline_mode<synchronous>, transform_indices = @transform_2, window_bounds = array<i64: 32, 128>}, {transform_indices = @transform_3, window_bounds = array<i64: 32, 128>}]} {
    %c0 = arith.constant 0 : index
    %c0_0 = arith.constant 0 : index
    %0 = vector.load %arg1[%c0, %c0_0] : memref<1x128xi32, #tpu.memory_space<vmem>>, vector<1x128xi32>
    %c255_i32 = arith.constant 255 : i32
    %1 = vector.broadcast %c255_i32 : i32 to vector<1x128xi32>
    %2 = arith.andi %0, %1 : vector<1x128xi32>
    %c8_i32 = arith.constant 8 : i32
    %3 = vector.broadcast %c8_i32 : i32 to vector<1x128xi32>
    %4 = arith.shrsi %0, %3 : vector<1x128xi32>
    %c4095_i32 = arith.constant 4095 : i32
    %5 = vector.broadcast %c4095_i32 : i32 to vector<1x128xi32>
    %6 = arith.andi %4, %5 : vector<1x128xi32>
    %c20_i32 = arith.constant 20 : i32
    %7 = vector.broadcast %c20_i32 : i32 to vector<1x128xi32>
    %8 = arith.shrsi %0, %7 : vector<1x128xi32>
    %c4095_i32_1 = arith.constant 4095 : i32
    %9 = vector.broadcast %c4095_i32_1 : i32 to vector<1x128xi32>
    %10 = arith.andi %8, %9 : vector<1x128xi32>
    %c0_2 = arith.constant 0 : index
    %c0_3 = arith.constant 0 : index
    %11 = vector.load %arg2[%c0_2, %c0_3] : memref<8x128xf32, #tpu.memory_space<vmem>>, vector<8x128xf32>
    %c0_4 = arith.constant 0 : index
    %c0_5 = arith.constant 0 : index
    %12 = vector.load %arg5[%c0_4, %c0_5] : memref<128x128xf32, #tpu.memory_space<vmem>>, vector<8x128xf32>
    tpu.vector_store %arg5[%c0_4, %c0_5], %11 {strides = array<i32>} : memref<128x128xf32, #tpu.memory_space<vmem>>, vector<8x128xf32>,
    %13 = tpu.iota {dimensions = array<i32: 0>} : vector<120x128xi32>
    %14 = vector.broadcast %2 : vector<1x128xi32> to vector<120x128xi32>
    %15 = arith.cmpi eq, %13, %14 : vector<120x128xi32>
    %16 = vector.broadcast %6 : vector<1x128xi32> to vector<120x128xi32>
    %17 = arith.cmpi eq, %13, %16 : vector<120x128xi32>
    %18 = arith.ori %15, %17 : vector<120x128xi1>
    %19 = vector.broadcast %10 : vector<1x128xi32> to vector<120x128xi32>
    %20 = arith.cmpi eq, %13, %19 : vector<120x128xi32>
    %21 = arith.ori %18, %20 : vector<120x128xi1>
    %22 = arith.extui %21 : vector<120x128xi1> to vector<120x128xi32>
    %23 = arith.sitofp %22 : vector<120x128xi32> to vector<120x128xf32>
    %c8 = arith.constant 8 : index
    %c0_6 = arith.constant 0 : index
    %24 = vector.load %arg5[%c8, %c0_6] : memref<128x128xf32, #tpu.memory_space<vmem>>, vector<120x128xf32>
    tpu.vector_store %arg5[%c8, %c0_6], %23 {strides = array<i32>} : memref<128x128xf32, #tpu.memory_space<vmem>>, vector<120x128xf32>,
    %c0_7 = arith.constant 0 : index
    %c0_8 = arith.constant 0 : index
    %25 = vector.load %arg3[%c0_7, %c0_8] : memref<32x128xf32, #tpu.memory_space<vmem>>, vector<32x128xf32>
    %c0_9 = arith.constant 0 : index
    %c0_10 = arith.constant 0 : index
    %26 = vector.load %arg5[%c0_9, %c0_10] : memref<128x128xf32, #tpu.memory_space<vmem>>, vector<128x128xf32>
    %cst = arith.constant dense<0.000000e+00> : vector<32x128xf32>
    %27 = tpu.matmul %25, %26, %cst {dimension_numbers = #tpu.dot_dimension_numbers<[1], [0], [0], [1], [0, 0, 1, 1], [], []>} : vector<32x128xf32>, vector<128x128xf32>, vector<32x128xf32> -> vector<32x128xf32>
    %c0_11 = arith.constant 0 : index
    %c0_12 = arith.constant 0 : index
    %28 = vector.load %arg4[%c0_11, %c0_12] : memref<32x128xf32, #tpu.memory_space<vmem>>, vector<32x128xf32>
    tpu.vector_store %arg4[%c0_11, %c0_12], %27 {strides = array<i32>} : memref<32x128xf32, #tpu.memory_space<vmem>>, vector<32x128xf32>,
    return
  }
  func.func @transform_0(%arg0: i32) -> (i32, i32) {
    %c0_i32 = arith.constant 0 : i32
    %c0_i32_0 = arith.constant 0 : i32
    return %c0_i32, %arg0 : i32, i32
  }
  func.func @transform_1(%arg0: i32) -> (i32, i32) {
    %c0_i32 = arith.constant 0 : i32
    %c0_i32_0 = arith.constant 0 : i32
    return %c0_i32, %arg0 : i32, i32
  }
  func.func @transform_2(%arg0: i32) -> (i32, i32) {
    %c0_i32 = arith.constant 0 : i32
    %c0_i32_0 = arith.constant 0 : i32
    %c0_i32_1 = arith.constant 0 : i32
    return %c0_i32, %c0_i32_0 : i32, i32
  }
  func.func @transform_3(%arg0: i32) -> (i32, i32) {
    %c0_i32 = arith.constant 0 : i32
    %c0_i32_0 = arith.constant 0 : i32
    return %c0_i32, %arg0 : i32, i32
  }
}

</mosaic_0001>

<bundles_post_ra>
// kernel: tpu_custom_call.1
= control target key start
LH: loop header
LB: loop body
LE: loop exit
PB: predicated region body
PF: predicated region fallthrough
CT: control target
= control target key end

     0   :  { %8 = vsyncpa [#allocation4], 0  ;;  %s759_s0 = inlined_call_operand.hbm [shape: s32[1,128], index: 0, kind: input, shape index: {}]   ;;  %s760_s1 = inlined_call_operand.hbm [shape: f32[8,128], index: 1, kind: input, shape index: {}]   ;;  %s761_s2 = inlined_call_operand.hbm [shape: f32[32,128], index: 2, kind: input, shape index: {}]   ;;  %s762_s3 = inlined_call_operand.hbm [shape: f32[32,128], index: 3, kind: output, shape index: {}]  }
   0x1   :  { %9 = vsyncpa [#allocation7], 0 }
   0x2   :  { %10 = vsyncpa [#allocation5], 0  ;;  %s577_s12 = smov [#allocation6]   ;;  %s578_s14 = smov [#allocation3]  }
   0x3   :  { %s27_s13 = sshll.u32 %s577_s12, 4  ;;  %s17_s15 = sshll.u32 %s578_s14, 4  ;;  %s28_s13 = int_to_ptr.vmem [resolvable:$true] %s27_s13  ;;  %s18_s15 = int_to_ptr.vmem [resolvable:$true] %s17_s15 }
   0x4   :  { %s483_s18 = scalar_lea.hbm %s760_s1, 128 }
   0x5   :  { %p484_p0 = scmp.ne.s32.totalorder %s760_s1, %s483_s18  ;;  %p487_p1 = scmp.lt.u32.totalorder %s483_s18, %s760_s1 }
   0x7   :  { %p489_p2 = pnand %p487_p1, %p484_p0 }
   0x9   :  { %492 = shalt.err (!%p489_p2)
}
   0xa   :  { %s493_s23 = scalar_lea.vmem %s28_s13, 128  ;;  %p498_p4 = scmp.lt.s32.totalorder %s28_s13, %s28_s13 }
   0xb   :  { %p494_p3 = scmp.ne.s32.totalorder %s28_s13, %s493_s23  ;;  %p499_p5 = scmp.lt.s32.totalorder %s493_s23, %s493_s23 }
   0xd   :  { %p500_p6 = por %p499_p5, %p498_p4 }
   0xf   :  { %p501_p7 = pnand %p500_p6, %p494_p3 }
  0x11   :  { %504 = shalt.err (!%p501_p7)
}
  0x12   :  { %30 = dma.hbm_to_vmem [thread:$0]  %s760_s1, 128, %s28_s13, [#allocation7]  }
  0x13   :  { %s505_s28 = scalar_lea.hbm %s759_s0, 16 }
  0x14   :  { %p506_p8 = scmp.ne.s32.totalorder %s759_s0, %s505_s28  ;;  %p509_p9 = scmp.lt.u32.totalorder %s505_s28, %s759_s0 }
  0x16   :  { %p511_p10 = pnand %p509_p9, %p506_p8 }
  0x18   :  { %514 = shalt.err (!%p511_p10)
}
  0x19   :  { %s515_s6 = scalar_lea.vmem %s18_s15, 16  ;;  %s519_s7 = scalar_lea.vmem %s18_s15, 32 }
  0x1a   :  { %p516_p11 = scmp.ne.s32.totalorder %s18_s15, %s515_s6  ;;  %p520_p12 = scmp.lt.s32.totalorder %s18_s15, %s18_s15 }
  0x1b   :  { %p521_p13 = scmp.lt.s32.totalorder %s519_s7, %s515_s6 }
  0x1d   :  { %p522_p0 = por %p521_p13, %p520_p12 }
  0x1f   :  { %p523_p1 = pnand %p522_p0, %p516_p11 }
  0x21   :  { %526 = shalt.err (!%p523_p1)
}
  0x22   :  { %20 = dma.hbm_to_vmem [thread:$0]  %s759_s0, 16, %s18_s15, [#allocation4]  }
  0x23   :  { %s579_s9 = smov [#allocation8]   ;;  %s527_s13 = scalar_lea.hbm %s761_s2, 512 }
  0x24   :  { %s36_s10 = sshll.u32 %s579_s9, 4  ;;  %p528_p2 = scmp.ne.s32.totalorder %s761_s2, %s527_s13  ;;  %s37_s10 = int_to_ptr.vmem [resolvable:$true] %s36_s10 }
  0x25   :  { %p531_p3 = scmp.lt.u32.totalorder %s527_s13, %s761_s2 }
  0x27   :  { %p533_p4 = pnand %p531_p3, %p528_p2 }
  0x29   :  { %536 = shalt.err (!%p533_p4)
}
  0x2a   :  { %s537_s19 = scalar_lea.vmem %s37_s10, 512  ;;  %p542_p6 = scmp.lt.s32.totalorder %s37_s10, %s37_s10 }
  0x2b   :  { %p538_p5 = scmp.ne.s32.totalorder %s37_s10, %s537_s19  ;;  %p543_p7 = scmp.lt.s32.totalorder %s537_s19, %s537_s19 }
  0x2d   :  { %p544_p8 = por %p543_p7, %p542_p6 }
  0x2f   :  { %p545_p9 = pnand %p544_p8, %p538_p5 }
  0x31   :  { %548 = shalt.err (!%p545_p9)
}
  0x32   :  { %s580_s0 = smov 128   ;;  %s581_s15 = smov 8  }
  0x33   :  { %42 = dma.hbm_to_vmem [thread:$0]  %s761_s2, 512, %s37_s10, [#allocation7], %s580_s0, %s580_s0, %s581_s15  }
  0x34   :  { %571 = dma.done.wait [#allocation4], 16  }
  0x35   :  { %572 = vsyncadd [#allocation4], 4294967280 }
  0x36   :  { %573 = dma.done.wait [#allocation7], 640  }
  0x37   :  { %574 = vsyncadd [#allocation7], 4294966656  ;;  %v60_v0 = vlaneseq  ;;  %v52_v3 = vld [vmem:[#allocation3] sm:$0x1]  ;;  %v208_v7 = vld [vmem:[#allocation8] sm:$0xff]  ;;  %v582_v16 = vmov 1.0  }
  0x38   :  { %v53_v4 = vand.u32 255, %v52_v3  ;;  %v54_v5 = vshra.s32 %v52_v3, 8  ;;  %v335_v6 = vshrl.u32 %v52_v3, 20  ;;  %v210_v8 = vld [vmem:[#allocation8 + $0x10] sm:$0xff]  ;;  %418 = vmatprep.mubr.f32.mxu0 %v208_v7  ;;  %v58_v12 = vld [vmem:[#allocation6] sm:$0xff]  ;;  %vm583_vm9 = vmmov 1  }
  0x39   :  { %v645_v1 = vshrl.u32 %v60_v0, 7  ;;  %421 = vmatprep.mubr.f32.mxu1 %v210_v8  ;;  %v424_v17 = vpack.c.bf16 %v582_v16, %v58_v12  ;;  %v584_v22 = vmov 1.0|1.0   ;;  %v209_v31 = vld [vmem:[#allocation8 + $0x8] sm:$0xff]  ;;  %v211_v32 = vld [vmem:[#allocation8 + $0x18] sm:$0xff]  ;;  %s585_s2 = smov [#allocation9]  }
  0x3a   :  { %v55_v9 = vand.u32 4095, %v54_v5  ;;  %s322_s22 = sshll.u32 %s585_s2, 4  ;;  %s323_s22 = int_to_ptr.vmem [resolvable:$true] %s322_s22 }
  0x3b   :  { %v78_v2 = vsub.s32 0, %v645_v1  ;;  %v62_v13 = vadd.s32 8, %v645_v1  ;;  %v63_v15 = vadd.s32 16, %v645_v1  ;;  %v64_v18 = vadd.s32 24, %v645_v1  ;;  %s549_s23 = scalar_lea.vmem %s323_s22, 512  ;;  %p554_p11 = scmp.lt.s32.totalorder %s323_s22, %s323_s22 }
  0x3c   :  { %v65_v19 = vadd.s32 32, %v645_v1  ;;  %v66_v20 = vadd.s32 40, %v645_v1  ;;  %v67_v21 = vadd.s32 48, %v645_v1  ;;  %v68_v23 = vadd.s32 56, %v645_v1  ;;  %p550_p10 = scmp.ne.s32.totalorder %s323_s22, %s549_s23  ;;  %p555_p12 = scmp.lt.s32.totalorder %s549_s23, %s549_s23 }
  0x3d   :  { %v648_v10 = vrot.slane %v53_v4, %v78_v2  ;;  %v650_v11 = vrot.slane %v335_v6, %v78_v2  ;;  %v655_v14 = vrot.slane %v55_v9, %v78_v2  ;;  %v69_v24 = vadd.s32 64, %v645_v1 }
  0x3e   :  { %v70_v25 = vadd.s32 72, %v645_v1  ;;  %v71_v26 = vadd.s32 80, %v645_v1  ;;  %v72_v27 = vadd.s32 88, %v645_v1  ;;  %v73_v28 = vadd.s32 96, %v645_v1  ;;  %p556_p13 = por %p555_p12, %p554_p11 }
  0x3f   :  { %vm80_vm0 = vcmp.eq.s32.totalorder %v645_v1, %v648_v10  ;;  %vm133_vm1 = vcmp.eq.s32.totalorder %v645_v1, %v650_v11  ;;  %vm99_vm2 = vcmp.eq.s32.totalorder %v645_v1, %v655_v14  ;;  %vm81_vm4 = vcmp.eq.s32.totalorder %v62_v13, %v648_v10 }
  0x40   :  { %vm114_vm3 = vmor %vm80_vm0, %vm99_vm2  ;;  %vm100_vm5 = vcmp.eq.s32.totalorder %v62_v13, %v655_v14  ;;  %vm82_vm7 = vcmp.eq.s32.totalorder %v63_v15, %v648_v10  ;;  %vm101_vm8 = vcmp.eq.s32.totalorder %v63_v15, %v655_v14  ;;  %vm134_vm11 = vcmp.eq.s32.totalorder %v62_v13, %v650_v11  ;;  %p557_p0 = pnand %p556_p13, %p550_p10 }
  0x41   :  { %vm148_vm6 = vmor %vm114_vm3, %vm133_vm1  ;;  %vm135_vm13 = vcmp.eq.s32.totalorder %v63_v15, %v650_v11  ;;  %vm83_vm0 = vcmp.eq.s32.totalorder %v64_v18, %v648_v10  ;;  %vm102_vm1 = vcmp.eq.s32.totalorder %v64_v18, %v655_v14  ;;  %vm84_vm3 = vcmp.eq.s32.totalorder %v65_v19, %v648_v10 }
  0x42   :  { %vm425_vm10 = vmpackc.low %vm148_vm6, %vm583_vm9  ;;  %vm103_vm6 = vcmp.eq.s32.totalorder %v65_v19, %v655_v14  ;;  %v74_v29 = vadd.s32 104, %v645_v1  ;;  %v75_v30 = vadd.s32 112, %v645_v1 }
  0x43   :  { %426 = vmatprep.subr.msk.bf16.mxu0 %vm425_vm10, %v424_v17  ;;  %458 = vmatprep.subr.msk.bf16.mxu1 %vm425_vm10, %v424_v17  ;;  %vm115_vm12 = vmor %vm81_vm4, %vm100_vm5  ;;  %vm136_vm4 = vcmp.eq.s32.totalorder %v64_v18, %v650_v11 }
  0x44   :  { %429 = vmatpush3.bf16.msk.msra.mxu0 %vm425_vm10, %v424_v17  ;;  %466 = vmatpush3.bf16.msk.msra.mxu1 %vm425_vm10, %v424_v17  ;;  %vm116_vm14 = vmor %vm82_vm7, %vm101_vm8  ;;  %vm137_vm7 = vcmp.eq.s32.totalorder %v65_v19, %v650_v11 }
  0x45   :  { %vm149_vm15 = vmor %vm115_vm12, %vm134_vm11  ;;  %vm85_vm11 = vcmp.eq.s32.totalorder %v66_v20, %v648_v10  ;;  %vm104_vm12 = vcmp.eq.s32.totalorder %v66_v20, %v655_v14 }
  0x46   :  { %vm150_vm2 = vmor %vm116_vm14, %vm135_vm13  ;;  %vm86_vm14 = vcmp.eq.s32.totalorder %v67_v21, %v648_v10 }
  0x47   :  { %vm430_vm9 = vmpackc.low %vm150_vm2, %vm149_vm15  ;;  %vm105_vm15 = vcmp.eq.s32.totalorder %v67_v21, %v655_v14 }
  0x48   :  { %431 = vmatprep.subr.msk.bf16.mxu0 %vm430_vm9, %v584_v22  ;;  %459 = vmatprep.subr.msk.bf16.mxu1 %vm430_vm9, %v584_v22  ;;  %vm117_vm5 = vmor %vm83_vm0, %vm102_vm1  ;;  %vm138_vm1 = vcmp.eq.s32.totalorder %v66_v20, %v650_v11 }
  0x49   :  { %433 = vmatpush3.bf16.msk.msra.mxu0 %vm430_vm9, %v584_v22  ;;  %467 = vmatpush3.bf16.msk.msra.mxu1 %vm430_vm9, %v584_v22  ;;  %vm118_vm8 = vmor %vm84_vm3, %vm103_vm6  ;;  %vm139_vm3 = vcmp.eq.s32.totalorder %v67_v21, %v650_v11 }
  0x4a   :  { %vm151_vm10 = vmor %vm117_vm5, %vm136_vm4  ;;  %vm87_vm4 = vcmp.eq.s32.totalorder %v68_v23, %v648_v10  ;;  %vm106_vm5 = vcmp.eq.s32.totalorder %v68_v23, %v655_v14 }
  0x4b   :  { %vm152_vm13 = vmor %vm118_vm8, %vm137_vm7  ;;  %vm88_vm8 = vcmp.eq.s32.totalorder %v69_v24, %v648_v10 }
  0x4c   :  { %vm434_vm0 = vmpackc.low %vm152_vm13, %vm151_vm10  ;;  %vm107_vm10 = vcmp.eq.s32.totalorder %v69_v24, %v655_v14 }
  0x4d   :  { %435 = vmatprep.subr.msk.bf16.mxu0 %vm434_vm0, %v584_v22  ;;  %460 = vmatprep.subr.msk.bf16.mxu1 %vm434_vm0, %v584_v22  ;;  %vm119_vm2 = vmor %vm85_vm11, %vm104_vm12  ;;  %vm140_vm12 = vcmp.eq.s32.totalorder %v68_v23, %v650_v11 }
  0x4e   :  { %437 = vmatpush3.bf16.msk.msra.mxu0 %vm434_vm0, %v584_v22  ;;  %468 = vmatpush3.bf16.msk.msra.mxu1 %vm434_vm0, %v584_v22  ;;  %vm120_vm6 = vmor %vm86_vm14, %vm105_vm15  ;;  %vm141_vm14 = vcmp.eq.s32.totalorder %v69_v24, %v650_v11 }
  0x4f   :  { %vm153_vm9 = vmor %vm119_vm2, %vm138_vm1  ;;  %vm89_vm1 = vcmp.eq.s32.totalorder %v70_v25, %v648_v10  ;;  %vm108_vm2 = vcmp.eq.s32.totalorder %v70_v25, %v655_v14 }
  0x50   :  { %vm154_vm7 = vmor %vm120_vm6, %vm139_vm3  ;;  %vm90_vm6 = vcmp.eq.s32.totalorder %v71_v26, %v648_v10 }
  0x51   :  { %vm438_vm11 = vmpackc.low %vm154_vm7, %vm153_vm9  ;;  %vm109_vm9 = vcmp.eq.s32.totalorder %v71_v26, %v655_v14 }
  0x52   :  { %439 = vmatprep.subr.msk.bf16.mxu0 %vm438_vm11, %v584_v22  ;;  %461 = vmatprep.subr.msk.bf16.mxu1 %vm438_vm11, %v584_v22  ;;  %vm121_vm13 = vmor %vm87_vm4, %vm106_vm5  ;;  %vm142_vm5 = vcmp.eq.s32.totalorder %v70_v25, %v650_v11 }
  0x53   :  { %441 = vmatpush3.bf16.msk.msra.mxu0 %vm438_vm11, %v584_v22  ;;  %469 = vmatpush3.bf16.msk.msra.mxu1 %vm438_vm11, %v584_v22  ;;  %vm122_vm15 = vmor %vm88_vm8, %vm107_vm10  ;;  %vm143_vm8 = vcmp.eq.s32.totalorder %v71_v26, %v650_v11 }
  0x54   :  { %vm155_vm0 = vmor %vm121_vm13, %vm140_vm12  ;;  %vm91_vm12 = vcmp.eq.s32.totalorder %v72_v27, %v648_v10  ;;  %vm110_vm13 = vcmp.eq.s32.totalorder %v72_v27, %v655_v14 }
  0x55   :  { %vm156_vm3 = vmor %vm122_vm15, %vm141_vm14  ;;  %vm92_vm15 = vcmp.eq.s32.totalorder %v73_v28, %v648_v10 }
  0x56   :  { %vm442_vm4 = vmpackc.low %vm156_vm3, %vm155_vm0  ;;  %vm111_vm0 = vcmp.eq.s32.totalorder %v73_v28, %v655_v14 }
  0x57   :  { %443 = vmatprep.subr.msk.bf16.mxu0 %vm442_vm4, %v584_v22  ;;  %462 = vmatprep.subr.msk.bf16.mxu1 %vm442_vm4, %v584_v22  ;;  %vm123_vm7 = vmor %vm89_vm1, %vm108_vm2  ;;  %vm144_vm2 = vcmp.eq.s32.totalorder %v72_v27, %v650_v11 }
  0x58   :  { %445 = vmatpush3.bf16.msk.msra.mxu0 %vm442_vm4, %v584_v22  ;;  %470 = vmatpush3.bf16.msk.msra.mxu1 %vm442_vm4, %v584_v22  ;;  %vm124_vm10 = vmor %vm90_vm6, %vm109_vm9  ;;  %vm145_vm6 = vcmp.eq.s32.totalorder %v73_v28, %v650_v11 }
  0x59   :  { %vm157_vm11 = vmor %vm123_vm7, %vm142_vm5  ;;  %vm93_vm5 = vcmp.eq.s32.totalorder %v74_v29, %v648_v10  ;;  %vm112_vm7 = vcmp.eq.s32.totalorder %v74_v29, %v655_v14 }
  0x5a   :  { %vm158_vm14 = vmor %vm124_vm10, %vm143_vm8  ;;  %vm94_vm10 = vcmp.eq.s32.totalorder %v75_v30, %v648_v10 }
  0x5b   :  { %vm446_vm1 = vmpackc.low %vm158_vm14, %vm157_vm11  ;;  %vm113_vm11 = vcmp.eq.s32.totalorder %v75_v30, %v655_v14 }
  0x5c   :  { %447 = vmatprep.subr.msk.bf16.mxu0 %vm446_vm1, %v584_v22  ;;  %463 = vmatprep.subr.msk.bf16.mxu1 %vm446_vm1, %v584_v22  ;;  %vm125_vm3 = vmor %vm91_vm12, %vm110_vm13  ;;  %vm146_vm12 = vcmp.eq.s32.totalorder %v74_v29, %v650_v11 }
  0x5d   :  { %449 = vmatpush3.bf16.msk.msra.mxu0 %vm446_vm1, %v584_v22  ;;  %471 = vmatpush3.bf16.msk.msra.mxu1 %vm446_vm1, %v584_v22  ;;  %vm126_vm9 = vmor %vm92_vm15, %vm111_vm0  ;;  %vm147_vm15 = vcmp.eq.s32.totalorder %v75_v30, %v650_v11 }
  0x5e   :  { %vm159_vm4 = vmor %vm125_vm3, %vm144_vm2 }
  0x5f   :  { %vm160_vm8 = vmor %vm126_vm9, %vm145_vm6 }
  0x60   :  { %vm450_vm14 = vmpackc.low %vm160_vm8, %vm159_vm4 }
  0x61   :  { %451 = vmatprep.subr.msk.bf16.mxu0 %vm450_vm14, %v584_v22  ;;  %464 = vmatprep.subr.msk.bf16.mxu1 %vm450_vm14, %v584_v22  ;;  %vm127_vm13 = vmor %vm93_vm5, %vm112_vm7 }
  0x62   :  { %453 = vmatpush3.bf16.msk.msra.mxu0 %vm450_vm14, %v584_v22  ;;  %472 = vmatpush3.bf16.msk.msra.mxu1 %vm450_vm14, %v584_v22  ;;  %vm128_vm0 = vmor %vm94_vm10, %vm113_vm11 }
  0x63   :  { %vm161_vm1 = vmor %vm127_vm13, %vm146_vm12 }
  0x64   :  { %vm162_vm2 = vmor %vm128_vm0, %vm147_vm15 }
  0x65   :  { %vm454_vm3 = vmpackc.low %vm162_vm2, %vm161_vm1 }
  0x66   :  { %455 = vmatprep.subr.msk.bf16.mxu0 %vm454_vm3, %v584_v22  ;;  %465 = vmatprep.subr.msk.bf16.mxu1 %vm454_vm3, %v584_v22 }
  0x67   :  { %457 = vmatpush3.bf16.msk.msra.mxu0 %vm454_vm3, %v584_v22  ;;  %473 = vmatpush3.bf16.msk.msra.mxu1 %vm454_vm3, %v584_v22 }
  0x6a   :  { %419 = vmatmul.mubr.f32.vlgmr.msra.gmra.mrb[0].mxu0 %v209_v31  ;;  %422 = vmatmul.mubr.f32.vlgmr.msra.gmra.mrb[0].mxu1 %v211_v32 }
 0x13d   :  { %v420_v33 = vpop.f32.mrb[0].mxu0  ;;  %v423_v34 = vpop.f32.mrb[0].mxu1 }
 0x13e   :  { %314 = vst [vmem:[#allocation9 + $0x8] sm:$0xff] %v420_v33  ;;  %316 = vst [vmem:[#allocation9 + $0x18] sm:$0xff] %v423_v34  ;;  %v294_v35 = vpop.f32.mrb[1].mxu0  ;;  %v304_v36 = vpop.f32.mrb[1].mxu1 }
 0x13f   :  { %313 = vst [vmem:[#allocation9] sm:$0xff] %v294_v35  ;;  %315 = vst [vmem:[#allocation9 + $0x10] sm:$0xff] %v304_v36 }
 0x140   :  { %560 = shalt.err (!%p557_p0)
}
 0x141   :  { %s561_s26 = scalar_lea.hbm %s762_s3, 512 }
 0x142   :  { %p562_p1 = scmp.ne.s32.totalorder %s762_s3, %s561_s26  ;;  %p565_p2 = scmp.lt.u32.totalorder %s561_s26, %s762_s3 }
 0x144   :  { %p567_p3 = pnand %p565_p2, %p562_p1 }
 0x146   :  { %570 = shalt.err (!%p567_p3)
}
 0x147   :  { %328 = dma.vmem_to_hbm [thread:$0]  %s323_s22, 512, %s762_s3, [#allocation5], %s580_s0, %s580_s0, %s581_s15  }
 0x148   :  { %575 = dma.done.wait [#allocation5], 512  }
 0x149   :  { %576 = vsyncadd [#allocation5], 4294966784 }
 0x14a   :  { %332 = vsyncpa [#allocation4], 1 }
 0x14b   :  { %333 = vsyncpa [#allocation7], 1 }
 0x14c   :  { %334 = vsyncpa [#allocation5], 1 }

</bundles_post_ra>
